<compile_context>
chip_gen: v6e
topology: v6e:2x2x1
jax: 0.10.0
libtpu: 0.0.40
codegen_flags: <defaults>
</compile_context>

<pallas_src>
import jax
import jax.numpy as jnp
from jax.experimental import pallas as pl
from jax.experimental.pallas import tpu as pltpu


# --------------------------------------------------------------------------
# Precomputed tiny operators (wrapper-side "glue", all O(H*W) sized)
# --------------------------------------------------------------------------
def upsample_reflect_matrix(n_in, n_out, pad=1):
    """(n_out + 2*pad, n_in) matrix = reflection-pad(1) o bilinear x2 upsample
    with align_corners=True (nn.UpsamplingBilinear2d semantics)."""
    i = jnp.arange(n_out, dtype=jnp.float32)
    src = i * (n_in - 1) / (n_out - 1)
    i0 = jnp.floor(src).astype(jnp.int32)
    i1 = jnp.minimum(i0 + 1, n_in - 1)
    frac = src - i0.astype(jnp.float32)
    U = (jax.nn.one_hot(i0, n_in, dtype=jnp.float32) * (1.0 - frac)[:, None]
         + jax.nn.one_hot(i1, n_in, dtype=jnp.float32) * frac[:, None])
    idx = jnp.concatenate([jnp.arange(pad, 0, -1),
                           jnp.arange(n_out),
                           jnp.arange(n_out - 2, n_out - 2 - pad, -1)])
    return U[idx]


# --------------------------------------------------------------------------
# Pallas kernel: fused upsample + reflect-pad + 3x3 conv + cond. instance norm
# (AdaIN) + LeakyReLU.  Nb batch elements per grid step, packed on lanes.
# --------------------------------------------------------------------------
def upsample_block_kernel(x_ref, a_ref, g_ref, gamma_ref, beta_ref,
                          s_ref, st_ref, o_ref):
    # x_ref     : (Nb*H, W*Cin)          bf16  pre-upsample rows, images stacked on M
    # a_ref     : (Ho, 3*H)              bf16  [A0|A1|A2] (H-upsample+pad, 3 ky shifts)
    # g_ref     : (3, W*Cin, Wo*Cout)    bf16  conv weight with W-upsample+pad+kx folded
    # gamma_ref : (1, 1, Nb*Wo*Cout)     f32   AdaIN gamma, per-image lane blocks
    # beta_ref  : (1, 1, Nb*Wo*Cout)     f32   AdaIN beta,  per-image lane blocks
    # s_ref     : (Nb*Wo*Cout, Nb*Cout)  f32   lane -> (image,channel) reduction
    # st_ref    : (Nb*Cout, Nb*Wo*Cout)  f32   (image,channel) -> lane broadcast
    # o_ref     : (1, Ho, Nb*Wo*Cout)          lane-dense output block
    ho = o_ref.shape[1]
    lanes = o_ref.shape[2]
    wc_out = g_ref.shape[2]
    nb = lanes // wc_out
    h = a_ref.shape[1] // 3
    cout = s_ref.shape[1] // nb
    wo = wc_out // cout
    inv_spatial = 1.0 / float(ho * wo)

    x = x_ref[...]                                   # (Nb*H, W*Cin) bf16

    # ---- Stage 1: per-ky conv matmul on PRE-upsample rows (M = Nb*H).
    #      Per-image row blocks are placed side-by-side on lanes so the final
    #      contraction produces a lane-dense (Ho, Nb*WC_out) tile.
    row_blocks = []
    for ky in range(3):
        u = jnp.dot(x, g_ref[ky], preferred_element_type=jnp.float32)
        u = u.astype(jnp.bfloat16)                   # (Nb*H, WC_out)
        if nb == 1:
            row_blocks.append(u)
        else:
            row_blocks.append(jnp.concatenate(
                [u[b * h:(b + 1) * h, :] for b in range(nb)], axis=1))
    u_all = jnp.concatenate(row_blocks, axis=0)      # (3H, Nb*WC_out) bf16

    # ---- Stage 2: single big-K contraction; ky accumulation stays in the MXU.
    acc = jnp.dot(a_ref[...], u_all,
                  preferred_element_type=jnp.float32)  # (Ho, Nb*WC_out) f32

    # ---- Stage 3: per-(image,channel) instance-norm stats in f32 via tiny
    #      selection-matrix matmuls (one-pass mean / E[x^2]).
    col_sum = jnp.sum(acc, axis=0, keepdims=True)              # (1, lanes)
    sq_sum = jnp.sum(acc * acc, axis=0, keepdims=True)         # (1, lanes)
    mean_c = jnp.dot(col_sum, s_ref[...],
                     preferred_element_type=jnp.float32) * inv_spatial
    ex2_c = jnp.dot(sq_sum, s_ref[...],
                    preferred_element_type=jnp.float32) * inv_spatial
    var_c = ex2_c - mean_c * mean_c
    inv_c = jax.lax.rsqrt(var_c + 1e-5)                        # (1, Nb*Cout)
    mean_l = jnp.dot(mean_c, st_ref[...], preferred_element_type=jnp.float32)
    inv_l = jnp.dot(inv_c, st_ref[...], preferred_element_type=jnp.float32)

    # ---- Stage 4: fold norm + AdaIN into one scale/shift, then LeakyReLU(0.01)
    scale_l = inv_l * gamma_ref[0]                             # (1, lanes)
    shift_l = beta_ref[0] - mean_l * scale_l                   # (1, lanes)
    y = acc * scale_l + shift_l
    y = jnp.maximum(y, 0.01 * y)
    o_ref[0] = y.astype(o_ref.dtype)


def upsample_block_pallas(x_nchw, latent, w_conv_oihw, w_style, b_style):
    """x_nchw: (N, Cin, H, W); latent: (N, L).  Returns (N, Cout, 2H, 2W)."""
    N, Cin, H, W = x_nchw.shape
    Cout = w_conv_oihw.shape[0]
    Ho, Wo = 2 * H, 2 * W
    WC_in = W * Cin
    WC_out = Wo * Cout
    f32, bf16 = jnp.float32, jnp.bfloat16

    # Batch-packing factor: images per grid step, packed on the output LANE
    # axis so the output last dim is a multiple of 128 (unmasked stores) and
    # the conv matmul M dim is Nb*H (better MXU fill).
    Nb = 1
    for cand in range(min(N, 8), 0, -1):
        if N % cand == 0 and (cand * WC_out) % 128 == 0:
            Nb = cand
            break
    lanes = Nb * WC_out

    # --- tiny precomputed operators ---------------------------------------
    A = upsample_reflect_matrix(H, Ho, pad=1)                 # (Ho+2, H)
    B = upsample_reflect_matrix(W, Wo, pad=1)                 # (Wo+2, W)
    A_cat = jnp.concatenate([A[ky:ky + Ho] for ky in range(3)], axis=1)  # (Ho, 3H)

    # conv weight OIHW -> HWIO, fold W-direction upsample+pad + kx taps into G
    w_hwio = jnp.transpose(w_conv_oihw, (2, 3, 1, 0)).astype(f32)   # (3,3,Cin,Cout)
    Bk = jnp.stack([B[kx:kx + Wo] for kx in range(3)], axis=0)      # (3, Wo, W)
    G = jnp.einsum("xvw,yxio->ywivo", Bk, w_hwio).reshape(3, WC_in, WC_out)

    # AdaIN affine precomputed from the latent (tiny matmul outside the kernel)
    style = latent.astype(f32) @ w_style.astype(f32) + b_style.astype(f32)[None, :]
    gamma_t = jnp.tile(style[:, :Cout], (1, Wo)).reshape(N // Nb, 1, lanes)
    beta_t = jnp.tile(style[:, Cout:], (1, Wo)).reshape(N // Nb, 1, lanes)

    # lane(b*WC_out + wo*Cout + co) <-> (image, channel) selection matrices
    S1 = jnp.tile(jnp.eye(Cout, dtype=f32), (Wo, 1))          # (WC_out, Cout)
    S = jnp.kron(jnp.eye(Nb, dtype=f32), S1)                  # (lanes, Nb*Cout)
    ST = jnp.transpose(S)                                     # (Nb*Cout, lanes)

    # bf16 MXU operands (f32 accumulation inside the kernel)
    x_rows = jnp.transpose(x_nchw, (0, 2, 3, 1)).reshape(N * H, WC_in).astype(bf16)
    A_bf = A_cat.astype(bf16)
    G_bf = G.astype(bf16)

    out_flat = pl.pallas_call(
        upsample_block_kernel,
        out_shape=jax.ShapeDtypeStruct((N // Nb, Ho, lanes), x_nchw.dtype),
        grid_spec=pltpu.PrefetchScalarGridSpec(
            num_scalar_prefetch=0,
            grid=(N // Nb,),
            in_specs=[
                pl.BlockSpec((Nb * H, WC_in), lambda n: (n, 0)),        # x rows
                pl.BlockSpec((Ho, 3 * H), lambda n: (0, 0)),            # [A0|A1|A2]
                pl.BlockSpec((3, WC_in, WC_out), lambda n: (0, 0, 0)),  # G
                pl.BlockSpec((1, 1, lanes), lambda n: (n, 0, 0)),       # gamma
                pl.BlockSpec((1, 1, lanes), lambda n: (n, 0, 0)),       # beta
                pl.BlockSpec((lanes, Nb * Cout), lambda n: (0, 0)),     # S
                pl.BlockSpec((Nb * Cout, lanes), lambda n: (0, 0)),     # S^T
            ],
            out_specs=pl.BlockSpec((1, Ho, lanes), lambda n: (n, 0, 0)),
        ),
        compiler_params=pltpu.CompilerParams(
            dimension_semantics=("parallel",),
            # Tiny footprint at these shapes; for production shapes raise this
            # on v5e/v6e (128 MiB parts) and keep <= ~48 MiB on v7x.
            vmem_limit_bytes=32 * 1024 * 1024,
        ),
    )(x_rows, A_bf, G_bf, gamma_t, beta_t, S, ST)

    # unpack lane-packed images back to NCHW
    out = out_flat.reshape(N // Nb, Ho, Nb, Wo, Cout)
    out = jnp.transpose(out, (0, 2, 1, 3, 4)).reshape(N, Ho, Wo, Cout)
    return jnp.transpose(out, (0, 3, 1, 2))


# --------------------------------------------------------------------------
# Pure-JAX f32 reference (independent gather-based formulation)
# --------------------------------------------------------------------------
def _upsample_bilinear_ac_nhwc(x, scale=2):
    n, h, w, c = x.shape
    ho, wo = h * scale, w * scale

    def coords(n_in, n_out):
        src = jnp.arange(n_out, dtype=jnp.float32) * (n_in - 1) / (n_out - 1)
        i0 = jnp.floor(src).astype(jnp.int32)
        i1 = jnp.minimum(i0 + 1, n_in - 1)
        return i0, i1, (src - i0.astype(jnp.float32)).astype(x.dtype)

    r0, r1, wr = coords(h, ho)
    c0, c1, wc = coords(w, wo)
    x00 = x[:, r0][:, :, c0]
    x01 = x[:, r0][:, :, c1]
    x10 = x[:, r1][:, :, c0]
    x11 = x[:, r1][:, :, c1]
    wr = wr[None, :, None, None]
    wc = wc[None, None, :, None]
    top = x00 * (1.0 - wc) + x01 * wc
    bot = x10 * (1.0 - wc) + x11 * wc
    return top * (1.0 - wr) + bot * wr


def upsample_block_reference(x_nchw, latent, w_conv_oihw, w_style, b_style):
    Cout = w_conv_oihw.shape[0]
    x_nhwc = jnp.transpose(x_nchw, (0, 2, 3, 1))
    x_up = _upsample_bilinear_ac_nhwc(x_nhwc, scale=2)
    x_pad = jnp.pad(x_up, ((0, 0), (1, 1), (1, 1), (0, 0)), mode="reflect")
    w_hwio = jnp.transpose(w_conv_oihw, (2, 3, 1, 0))
    y = jax.lax.conv_general_dilated(
        x_pad, w_hwio, window_strides=(1, 1), padding="VALID",
        dimension_numbers=("NHWC", "HWIO", "NHWC"))
    mean = y.mean(axis=(1, 2), keepdims=True)
    var = ((y - mean) ** 2).mean(axis=(1, 2), keepdims=True)
    yhat = (y - mean) / jnp.sqrt(var + 1e-5)
    style = latent @ w_style + b_style[None, :]
    gamma = style[:, :Cout][:, None, None, :]
    beta = style[:, Cout:][:, None, None, :]
    z = yhat * gamma + beta
    z = jnp.where(z >= 0.0, z, 0.01 * z)
    return jnp.transpose(z, (0, 3, 1, 2))


if __name__ == "__main__":
    # Small deterministic shapes consistent with the module
    N, Cin, H, W = 2, 4, 16, 16
    Cout = Cin // 2
    L = 8  # latent dim

    key = jax.random.PRNGKey(0)
    kx, klat, kw, kws, kbs = jax.random.split(key, 5)

    x = jax.random.normal(kx, (N, Cin, H, W), dtype=jnp.float32)
    latent = jax.random.normal(klat, (N, L), dtype=jnp.float32)

    # deterministic synthetic parameters (conv has no bias per the module)
    w_conv = 0.1 * jax.random.normal(kw, (Cout, Cin, 3, 3), dtype=jnp.float32)
    w_style = 0.1 * jax.random.normal(kws, (L, 2 * Cout), dtype=jnp.float32)
    b_style = jnp.concatenate(
        [jnp.ones((Cout,), jnp.float32),          # gamma centered at 1
         jnp.zeros((Cout,), jnp.float32)])        # beta centered at 0

    fwd = jax.jit(upsample_block_pallas)
    out = jax.block_until_ready(fwd(x, latent, w_conv, w_style, b_style))
    ref = jax.block_until_ready(
        upsample_block_reference(x, latent, w_conv, w_style, b_style))

    assert out.shape == (N, Cout, 2 * H, 2 * W), out.shape
    # bf16 MXU operands with f32 accumulation: compare at bf16-level tolerance
    err = float(jnp.max(jnp.abs(out - ref)))
    assert err < 5e-2, err

    print("KERNEL_OK")
</pallas_src>

<mosaic_0001>
module attributes {stable_mosaic.version = 11 : i64} {
  func.func @upsample_block_kernel(%arg0: i32, %arg1: memref<32x64xbf16, #tpu.memory_space<vmem>>, %arg2: memref<32x48xbf16, #tpu.memory_space<vmem>>, %arg3: memref<3x64x64xbf16, #tpu.memory_space<vmem>>, %arg4: memref<1x1x128xf32, #tpu.memory_space<vmem>>, %arg5: memref<1x1x128xf32, #tpu.memory_space<vmem>>, %arg6: memref<128x4xf32, #tpu.memory_space<vmem>>, %arg7: memref<4x128xf32, #tpu.memory_space<vmem>>, %arg8: memref<1x32x128xf32, #tpu.memory_space<vmem>>) attributes {dimension_semantics = [#tpu.dimension_semantics<parallel>], iteration_bounds = array<i64: 1>, scalar_prefetch = 0 : i64, scratch_operands = 0 : i64, tpu.core_type = #tpu.core_type<tc>, window_params = [{transform_indices = @transform_0, window_bounds = array<i64: 32, 64>}, {pipeline_mode = #tpu.pipeline_mode<synchronous>, transform_indices = @transform_1, window_bounds = array<i64: 32, 48>}, {pipeline_mode = #tpu.pipeline_mode<synchronous>, transform_indices = @transform_2, window_bounds = array<i64: 3, 64, 64>}, {transform_indices = @transform_3, window_bounds = array<i64: 1, 1, 128>}, {transform_indices = @transform_4, window_bounds = array<i64: 1, 1, 128>}, {pipeline_mode = #tpu.pipeline_mode<synchronous>, transform_indices = @transform_5, window_bounds = array<i64: 128, 4>}, {pipeline_mode = #tpu.pipeline_mode<synchronous>, transform_indices = @transform_6, window_bounds = array<i64: 4, 128>}, {transform_indices = @transform_7, window_bounds = array<i64: 1, 32, 128>}]} {
    %c0 = arith.constant 0 : index
    %c0_0 = arith.constant 0 : index
    %0 = vector.load %arg1[%c0, %c0_0] : memref<32x64xbf16, #tpu.memory_space<vmem>>, vector<32x64xbf16>
    %c0_1 = arith.constant 0 : index
    %c0_2 = arith.constant 0 : index
    %c0_3 = arith.constant 0 : index
    %1 = vector.load %arg3[%c0_1, %c0_2, %c0_3] : memref<3x64x64xbf16, #tpu.memory_space<vmem>>, vector<1x64x64xbf16>
    %2 = vector.shape_cast %1 : vector<1x64x64xbf16> to vector<64x64xbf16>
    %cst = arith.constant dense<0.000000e+00> : vector<32x64xf32>
    %3 = tpu.matmul %0, %2, %cst {dimension_numbers = #tpu.dot_dimension_numbers<[1], [0], [0], [1], [0, 0, 1, 1], [], []>} : vector<32x64xbf16>, vector<64x64xbf16>, vector<32x64xf32> -> vector<32x64xf32>
    %4 = arith.truncf %3 : vector<32x64xf32> to vector<32x64xbf16>
    %5 = vector.extract_strided_slice %4 {offsets = [0, 0], sizes = [16, 64], strides = [1, 1]} : vector<32x64xbf16> to vector<16x64xbf16>
    %6 = vector.extract_strided_slice %4 {offsets = [16, 0], sizes = [16, 64], strides = [1, 1]} : vector<32x64xbf16> to vector<16x64xbf16>
    %7 = tpu.concatenate %5, %6 in 1 : vector<16x64xbf16>, vector<16x64xbf16> -> vector<16x128xbf16>
    %c1 = arith.constant 1 : index
    %c0_4 = arith.constant 0 : index
    %c0_5 = arith.constant 0 : index
    %8 = vector.load %arg3[%c1, %c0_4, %c0_5] : memref<3x64x64xbf16, #tpu.memory_space<vmem>>, vector<1x64x64xbf16>
    %9 = vector.shape_cast %8 : vector<1x64x64xbf16> to vector<64x64xbf16>
    %cst_6 = arith.constant dense<0.000000e+00> : vector<32x64xf32>
    %10 = tpu.matmul %0, %9, %cst_6 {dimension_numbers = #tpu.dot_dimension_numbers<[1], [0], [0], [1], [0, 0, 1, 1], [], []>} : vector<32x64xbf16>, vector<64x64xbf16>, vector<32x64xf32> -> vector<32x64xf32>
    %11 = arith.truncf %10 : vector<32x64xf32> to vector<32x64xbf16>
    %12 = vector.extract_strided_slice %11 {offsets = [0, 0], sizes = [16, 64], strides = [1, 1]} : vector<32x64xbf16> to vector<16x64xbf16>
    %13 = vector.extract_strided_slice %11 {offsets = [16, 0], sizes = [16, 64], strides = [1, 1]} : vector<32x64xbf16> to vector<16x64xbf16>
    %14 = tpu.concatenate %12, %13 in 1 : vector<16x64xbf16>, vector<16x64xbf16> -> vector<16x128xbf16>
    %c2 = arith.constant 2 : index
    %c0_7 = arith.constant 0 : index
    %c0_8 = arith.constant 0 : index
    %15 = vector.load %arg3[%c2, %c0_7, %c0_8] : memref<3x64x64xbf16, #tpu.memory_space<vmem>>, vector<1x64x64xbf16>
    %16 = vector.shape_cast %15 : vector<1x64x64xbf16> to vector<64x64xbf16>
    %cst_9 = arith.constant dense<0.000000e+00> : vector<32x64xf32>
    %17 = tpu.matmul %0, %16, %cst_9 {dimension_numbers = #tpu.dot_dimension_numbers<[1], [0], [0], [1], [0, 0, 1, 1], [], []>} : vector<32x64xbf16>, vector<64x64xbf16>, vector<32x64xf32> -> vector<32x64xf32>
    %18 = arith.truncf %17 : vector<32x64xf32> to vector<32x64xbf16>
    %19 = vector.extract_strided_slice %18 {offsets = [0, 0], sizes = [16, 64], strides = [1, 1]} : vector<32x64xbf16> to vector<16x64xbf16>
    %20 = vector.extract_strided_slice %18 {offsets = [16, 0], sizes = [16, 64], strides = [1, 1]} : vector<32x64xbf16> to vector<16x64xbf16>
    %21 = tpu.concatenate %19, %20 in 1 : vector<16x64xbf16>, vector<16x64xbf16> -> vector<16x128xbf16>
    %22 = tpu.concatenate %7, %14, %21 in 0 : vector<16x128xbf16>, vector<16x128xbf16>, vector<16x128xbf16> -> vector<48x128xbf16>
    %c0_10 = arith.constant 0 : index
    %c0_11 = arith.constant 0 : index
    %23 = vector.load %arg2[%c0_10, %c0_11] : memref<32x48xbf16, #tpu.memory_space<vmem>>, vector<32x48xbf16>
    %cst_12 = arith.constant dense<0.000000e+00> : vector<32x128xf32>
    %24 = tpu.matmul %23, %22, %cst_12 {dimension_numbers = #tpu.dot_dimension_numbers<[1], [0], [0], [1], [0, 0, 1, 1], [], []>} : vector<32x48xbf16>, vector<48x128xbf16>, vector<32x128xf32> -> vector<32x128xf32>
    %cst_13 = arith.constant dense<0.000000e+00> : vector<128xf32>
    %25 = vector.multi_reduction <add>, %24, %cst_13 [0] : vector<32x128xf32> to vector<128xf32>
    %26 = vector.shape_cast %25 : vector<128xf32> to vector<1x128xf32>
    %27 = arith.mulf %24, %24 : vector<32x128xf32>
    %cst_14 = arith.constant dense<0.000000e+00> : vector<128xf32>
    %28 = vector.multi_reduction <add>, %27, %cst_14 [0] : vector<32x128xf32> to vector<128xf32>
    %29 = vector.shape_cast %28 : vector<128xf32> to vector<1x128xf32>
    %c0_15 = arith.constant 0 : index
    %c0_16 = arith.constant 0 : index
    %30 = vector.load %arg6[%c0_15, %c0_16] : memref<128x4xf32, #tpu.memory_space<vmem>>, vector<128x4xf32>
    %cst_17 = arith.constant dense<0.000000e+00> : vector<1x4xf32>
    %31 = tpu.matmul %26, %30, %cst_17 {dimension_numbers = #tpu.dot_dimension_numbers<[1], [0], [0], [1], [0, 0, 1, 1], [], []>} : vector<1x128xf32>, vector<128x4xf32>, vector<1x4xf32> -> vector<1x4xf32>
    %cst_18 = arith.constant 9.765625E-4 : f32
    %32 = vector.broadcast %cst_18 : f32 to vector<1x4xf32>
    %33 = arith.mulf %31, %32 : vector<1x4xf32>
    %c0_19 = arith.constant 0 : index
    %c0_20 = arith.constant 0 : index
    %34 = vector.load %arg6[%c0_19, %c0_20] : memref<128x4xf32, #tpu.memory_space<vmem>>, vector<128x4xf32>
    %cst_21 = arith.constant dense<0.000000e+00> : vector<1x4xf32>
    %35 = tpu.matmul %29, %34, %cst_21 {dimension_numbers = #tpu.dot_dimension_numbers<[1], [0], [0], [1], [0, 0, 1, 1], [], []>} : vector<1x128xf32>, vector<128x4xf32>, vector<1x4xf32> -> vector<1x4xf32>
    %cst_22 = arith.constant 9.765625E-4 : f32
    %36 = vector.broadcast %cst_22 : f32 to vector<1x4xf32>
    %37 = arith.mulf %35, %36 : vector<1x4xf32>
    %38 = arith.mulf %33, %33 : vector<1x4xf32>
    %39 = arith.subf %37, %38 : vector<1x4xf32>
    %cst_23 = arith.constant 9.99999974E-6 : f32
    %40 = vector.broadcast %cst_23 : f32 to vector<1x4xf32>
    %41 = arith.addf %39, %40 : vector<1x4xf32>
    %42 = math.rsqrt %41 : vector<1x4xf32>
    %c0_24 = arith.constant 0 : index
    %c0_25 = arith.constant 0 : index
    %43 = vector.load %arg7[%c0_24, %c0_25] : memref<4x128xf32, #tpu.memory_space<vmem>>, vector<4x128xf32>
    %cst_26 = arith.constant dense<0.000000e+00> : vector<1x128xf32>
    %44 = tpu.matmul %33, %43, %cst_26 {dimension_numbers = #tpu.dot_dimension_numbers<[1], [0], [0], [1], [0, 0, 1, 1], [], []>} : vector<1x4xf32>, vector<4x128xf32>, vector<1x128xf32> -> vector<1x128xf32>
    %c0_27 = arith.constant 0 : index
    %c0_28 = arith.constant 0 : index
    %45 = vector.load %arg7[%c0_27, %c0_28] : memref<4x128xf32, #tpu.memory_space<vmem>>, vector<4x128xf32>
    %cst_29 = arith.constant dense<0.000000e+00> : vector<1x128xf32>
    %46 = tpu.matmul %42, %45, %cst_29 {dimension_numbers = #tpu.dot_dimension_numbers<[1], [0], [0], [1], [0, 0, 1, 1], [], []>} : vector<1x4xf32>, vector<4x128xf32>, vector<1x128xf32> -> vector<1x128xf32>
    %c0_30 = arith.constant 0 : index
    %c0_31 = arith.constant 0 : index
    %c0_32 = arith.constant 0 : index
    %47 = vector.load %arg4[%c0_30, %c0_31, %c0_32] : memref<1x1x128xf32, #tpu.memory_space<vmem>>, vector<1x1x128xf32>
    %48 = vector.shape_cast %47 : vector<1x1x128xf32> to vector<1x128xf32>
    %49 = arith.mulf %46, %48 : vector<1x128xf32>
    %c0_33 = arith.constant 0 : index
    %c0_34 = arith.constant 0 : index
    %c0_35 = arith.constant 0 : index
    %50 = vector.load %arg5[%c0_33, %c0_34, %c0_35] : memref<1x1x128xf32, #tpu.memory_space<vmem>>, vector<1x1x128xf32>
    %51 = vector.shape_cast %50 : vector<1x1x128xf32> to vector<1x128xf32>
    %52 = arith.mulf %44, %49 : vector<1x128xf32>
    %53 = arith.subf %51, %52 : vector<1x128xf32>
    %54 = vector.broadcast %49 : vector<1x128xf32> to vector<32x128xf32>
    %55 = arith.mulf %24, %54 : vector<32x128xf32>
    %56 = vector.broadcast %53 : vector<1x128xf32> to vector<32x128xf32>
    %57 = arith.addf %55, %56 : vector<32x128xf32>
    %cst_36 = arith.constant 0.00999999977 : f32
    %58 = vector.broadcast %cst_36 : f32 to vector<32x128xf32>
    %59 = arith.mulf %58, %57 : vector<32x128xf32>
    %60 = arith.maximumf %57, %59 : vector<32x128xf32>
    %c0_37 = arith.constant 0 : index
    %c0_38 = arith.constant 0 : index
    %c0_39 = arith.constant 0 : index
    %61 = vector.load %arg8[%c0_37, %c0_38, %c0_39] : memref<1x32x128xf32, #tpu.memory_space<vmem>>, vector<1x32x128xf32>
    %62 = vector.shape_cast %61 : vector<1x32x128xf32> to vector<32x128xf32>
    %63 = vector.shape_cast %60 : vector<32x128xf32> to vector<1x32x128xf32>
    tpu.vector_store %arg8[%c0_37, %c0_38, %c0_39], %63 {strides = array<i32>} : memref<1x32x128xf32, #tpu.memory_space<vmem>>, vector<1x32x128xf32>,
    return
  }
  func.func @transform_0(%arg0: i32) -> (i32, i32) {
    %c0_i32 = arith.constant 0 : i32
    %c0_i32_0 = arith.constant 0 : i32
    return %arg0, %c0_i32 : i32, i32
  }
  func.func @transform_1(%arg0: i32) -> (i32, i32) {
    %c0_i32 = arith.constant 0 : i32
    %c0_i32_0 = arith.constant 0 : i32
    %c0_i32_1 = arith.constant 0 : i32
    return %c0_i32, %c0_i32_0 : i32, i32
  }
  func.func @transform_2(%arg0: i32) -> (i32, i32, i32) {
    %c0_i32 = arith.constant 0 : i32
    %c0_i32_0 = arith.constant 0 : i32
    %c0_i32_1 = arith.constant 0 : i32
    %c0_i32_2 = arith.constant 0 : i32
    return %c0_i32, %c0_i32_0, %c0_i32_1 : i32, i32, i32
  }
  func.func @transform_3(%arg0: i32) -> (i32, i32, i32) {
    %c0_i32 = arith.constant 0 : i32
    %c0_i32_0 = arith.constant 0 : i32
    %c0_i32_1 = arith.constant 0 : i32
    return %arg0, %c0_i32, %c0_i32_0 : i32, i32, i32
  }
  func.func @transform_4(%arg0: i32) -> (i32, i32, i32) {
    %c0_i32 = arith.constant 0 : i32
    %c0_i32_0 = arith.constant 0 : i32
    %c0_i32_1 = arith.constant 0 : i32
    return %arg0, %c0_i32, %c0_i32_0 : i32, i32, i32
  }
  func.func @transform_5(%arg0: i32) -> (i32, i32) {
    %c0_i32 = arith.constant 0 : i32
    %c0_i32_0 = arith.constant 0 : i32
    %c0_i32_1 = arith.constant 0 : i32
    return %c0_i32, %c0_i32_0 : i32, i32
  }
  func.func @transform_6(%arg0: i32) -> (i32, i32) {
    %c0_i32 = arith.constant 0 : i32
    %c0_i32_0 = arith.constant 0 : i32
    %c0_i32_1 = arith.constant 0 : i32
    return %c0_i32, %c0_i32_0 : i32, i32
  }
  func.func @transform_7(%arg0: i32) -> (i32, i32, i32) {
    %c0_i32 = arith.constant 0 : i32
    %c0_i32_0 = arith.constant 0 : i32
    %c0_i32_1 = arith.constant 0 : i32
    return %arg0, %c0_i32, %c0_i32_0 : i32, i32, i32
  }
}

</mosaic_0001>

<bundles_post_ra>
// kernel: upsample_block_pallas.1
= control target key start
LH: loop header
LB: loop body
LE: loop exit
PB: predicated region body
PF: predicated region fallthrough
CT: control target
= control target key end

     0   :  { %vm73_vm0 = vcmask 523264   ;;  %s1017_s28 = smov 64   ;;  %vm334_vm1 = vcmask 392192   ;;  %v1018_v29 = vmov 0.0   ;;  %vm1019_vm2 = vmmov 0   ;;  %s1248_s2 = inlined_call_operand.vmem [shape: bf16[3,64,64], index: 2, kind: input, shape index: {}]   ;;  %s1249_s0 = inlined_call_operand.vmem [shape: bf16[32,64], index: 0, kind: input, shape index: {}]   ;;  %s1250_s1 = inlined_call_operand.vmem [shape: bf16[32,48], index: 1, kind: input, shape index: {}]   ;;  %s1251_s5 = inlined_call_operand.vmem [shape: f32[128,4], index: 5, kind: input, shape index: {}]   ;;  %s1252_s6 = inlined_call_operand.vmem [shape: f32[4,128], index: 6, kind: input, shape index: {}]   ;;  %s1253_s3 = inlined_call_operand.vmem [shape: f32[1,1,128], index: 3, kind: input, shape index: {}]   ;;  %s1254_s4 = inlined_call_operand.vmem [shape: f32[1,1,128], index: 4, kind: input, shape index: {}]   ;;  %s1255_s7 = inlined_call_operand.vmem [shape: f32[1,32,128], index: 7, kind: output, shape index: {}]  }
   0x1   :  { %v999_v0 = vld [vmem:[%s1248_s2 + $0x18] sm:$0xff]   ;;  %v1000_v1 = vld [vmem:[%s1248_s2 + $0x10] sm:$0xff]   ;;  %v1001_v2 = vld [vmem:[%s1248_s2 + $0x8] sm:$0xff]   ;;  %vm579_vm3 = vcmask 1043456   ;;  %vm575_vm4 = vcmask 31744  }
   0x2   :  { %870 = vmatprep.subr.bf16.mxu0 %v999_v0  ;;  %v1003_v3 = vld [vmem:[%s1248_s2 + $0x38] sm:$0xff]   ;;  %v1004_v4 = vld [vmem:[%s1249_s0] sm:$0xff]   ;;  %v1007_v6 = vld [vmem:[%s1248_s2 + $0x30] sm:$0xff]  }
   0x3   :  { %871 = vmatpush3.bf16.msra.mxu0 %v999_v0  ;;  %882 = vmatprep.subr.bf16.mxu1 %v1003_v3  ;;  %v1002_v5 = vld [vmem:[%s1248_s2] sm:$0xff]   ;;  %v1009_v7 = vld [vmem:[%s1248_s2 + $0x28] sm:$0xff]   ;;  %v1006_v8 = vld [vmem:[%s1248_s2 + $0x58] sm:$0xff]  }
   0x4   :  { %872 = vmatprep.subr.bf16.mxu0 %v1000_v1  ;;  %878 = vmatprep.mubr.msk.bf16.mxu0 %vm73_vm0, %v1004_v4  ;;  %v1011_v9 = vld [vmem:[%s1248_s2 + $0x20] sm:$0xff]   ;;  %v1005_v10 = vld [vmem:[%s1249_s0 + $0x8] sm:$0xff]   ;;  %v1008_v11 = vld [vmem:[%s1248_s2 + $0x50] sm:$0xff]  }
   0x5   :  { %883 = vmatpush3.bf16.msra.mxu1 %v1003_v3  ;;  %890 = vmatprep.mubr.msk.bf16.mxu1 %vm73_vm0, %v1004_v4  ;;  %v1010_v12 = vld [vmem:[%s1248_s2 + $0x48] sm:$0xff]   ;;  %v1012_v13 = vld [vmem:[%s1248_s2 + $0x40] sm:$0xff]   ;;  %v427_v28 = vld [vmem:[%s1251_s5 + $0x78] sm:$0xff] }
   0x6   :  { %884 = vmatprep.subr.bf16.mxu1 %v1007_v6  ;;  %v1013_v25 = vld [vmem:[%s1250_s1] sm:$0xff]   ;;  %v426_v31 = vld [vmem:[%s1251_s5 + $0x70] sm:$0xff]  ;;  %v425_v32 = vld [vmem:[%s1251_s5 + $0x68] sm:$0xff] }
   0x7   :  { %873 = vmatpush3.bf16.msra.mxu0 %v1000_v1  ;;  %v1014_v43 = vld [vmem:[%s1250_s1 + $0x8] sm:$0xff]   ;;  %v424_v44 = vld [vmem:[%s1251_s5 + $0x60] sm:$0xff]  ;;  %v423_v45 = vld [vmem:[%s1251_s5 + $0x58] sm:$0xff] }
   0x8   :  { %874 = vmatprep.subr.bf16.mxu0 %v1001_v2  ;;  %v422_v46 = vld [vmem:[%s1251_s5 + $0x50] sm:$0xff]  ;;  %v421_v47 = vld [vmem:[%s1251_s5 + $0x48] sm:$0xff]  ;;  %v420_v48 = vld [vmem:[%s1251_s5 + $0x40] sm:$0xff] }
   0x9   :  { %885 = vmatpush3.bf16.msra.mxu1 %v1007_v6  ;;  %v419_v49 = vld [vmem:[%s1251_s5 + $0x38] sm:$0xff]  ;;  %v418_v50 = vld [vmem:[%s1251_s5 + $0x30] sm:$0xff]  ;;  %v417_v51 = vld [vmem:[%s1251_s5 + $0x28] sm:$0xff] }
   0xa   :  { %886 = vmatprep.subr.bf16.mxu1 %v1009_v7  ;;  %v416_v52 = vld [vmem:[%s1251_s5 + $0x20] sm:$0xff]  ;;  %v415_v53 = vld [vmem:[%s1251_s5 + $0x18] sm:$0xff]  ;;  %v414_v54 = vld [vmem:[%s1251_s5 + $0x10] sm:$0xff] }
   0xb   :  { %875 = vmatpush3.bf16.msra.mxu0 %v1001_v2  ;;  %v413_v55 = vld [vmem:[%s1251_s5 + $0x8] sm:$0xff]  ;;  %v412_v56 = vld [vmem:[%s1251_s5] sm:$0xff] }
   0xc   :  { %876 = vmatprep.subr.bf16.mxu0 %v1002_v5 }
   0xd   :  { %887 = vmatpush3.bf16.msra.mxu1 %v1009_v7 }
   0xe   :  { %888 = vmatprep.subr.bf16.mxu1 %v1011_v9 }
   0xf   :  { %877 = vmatpush3.bf16.msra.mxu0 %v1002_v5 }
  0x10   :  { %894 = vmatprep.subr.bf16.mxu0 %v1006_v8 }
  0x11   :  { %889 = vmatpush3.bf16.msra.mxu1 %v1011_v9 }
  0x12   :  { %879 = vmatmul.mubr.msk.bf16.vlgmr.msra.gmra.mxu0 %vm73_vm0, %v1005_v10 }
  0x13   :  { %895 = vmatpush3.bf16.msra.mxu0 %v1006_v8  ;;  %902 = vmatprep.mubr.msk.bf16.mxu0 %vm73_vm0, %v1004_v4 }
  0x14   :  { %896 = vmatprep.subr.bf16.mxu0 %v1008_v11  ;;  %891 = vmatmul.mubr.msk.bf16.vlgmr.msra.gmra.mxu1 %vm73_vm0, %v1005_v10 }
  0x15   :  { %912 = vmatprep.mubr.msk.bf16.mxu1 %vm334_vm1, %v1013_v25 }
  0x17   :  { %897 = vmatpush3.bf16.msra.mxu0 %v1008_v11 }
  0x18   :  { %898 = vmatprep.subr.bf16.mxu0 %v1010_v12 }
  0x1b   :  { %899 = vmatpush3.bf16.msra.mxu0 %v1010_v12 }
  0x1c   :  { %900 = vmatprep.subr.bf16.mxu0 %v1012_v13 }
  0x1f   :  { %901 = vmatpush3.bf16.msra.mxu0 %v1012_v13 }
  0x20   :  { %951 = vmatprep.subr.mxu0 %v1018_v29 }
  0x22   :  { %903 = vmatmul.mubr.msk.bf16.vlgmr.msra.gmra.mxu0 %vm73_vm0, %v1005_v10 }
  0x23   :  { %952 = vmatpush3.msra.mxu0 %v427_v28  ;;  %983 = vmatprep.mubr.msk.f32.mxu0 %vm1019_vm2, %v1018_v29 }
  0x24   :  { %953 = vmatprep.subr.mxu0 %v1018_v29 }
  0x25   :  { %954 = vmatpush3.msra.mxu0 %v426_v31 }
  0x26   :  { %955 = vmatprep.subr.mxu0 %v1018_v29 }
  0x27   :  { %956 = vmatpush3.msra.mxu0 %v425_v32 }
  0x28   :  { %957 = vmatprep.subr.mxu0 %v1018_v29 }
  0x29   :  { %958 = vmatpush3.msra.mxu0 %v424_v44 }
  0x2a   :  { %959 = vmatprep.subr.mxu0 %v1018_v29 }
  0x2b   :  { %960 = vmatpush3.msra.mxu0 %v423_v45 }
  0x2c   :  { %961 = vmatprep.subr.mxu0 %v1018_v29 }
  0x2d   :  { %962 = vmatpush3.msra.mxu0 %v422_v46 }
  0x2e   :  { %963 = vmatprep.subr.mxu0 %v1018_v29 }
  0x2f   :  { %964 = vmatpush3.msra.mxu0 %v421_v47 }
  0x30   :  { %965 = vmatprep.subr.mxu0 %v1018_v29 }
  0x31   :  { %966 = vmatpush3.msra.mxu0 %v420_v48 }
  0x32   :  { %967 = vmatprep.subr.mxu0 %v1018_v29 }
  0x33   :  { %968 = vmatpush3.msra.mxu0 %v419_v49 }
  0x34   :  { %969 = vmatprep.subr.mxu0 %v1018_v29 }
  0x35   :  { %970 = vmatpush3.msra.mxu0 %v418_v50 }
  0x36   :  { %971 = vmatprep.subr.mxu0 %v1018_v29 }
  0x37   :  { %972 = vmatpush3.msra.mxu0 %v417_v51 }
  0x38   :  { %973 = vmatprep.subr.mxu0 %v1018_v29 }
  0x39   :  { %974 = vmatpush3.msra.mxu0 %v416_v52 }
  0x3a   :  { %975 = vmatprep.subr.mxu0 %v1018_v29 }
  0x3b   :  { %976 = vmatpush3.msra.mxu0 %v415_v53 }
  0x3c   :  { %977 = vmatprep.subr.mxu0 %v1018_v29 }
  0x3d   :  { %978 = vmatpush3.msra.mxu0 %v414_v54 }
  0x3e   :  { %979 = vmatprep.subr.mxu0 %v1018_v29 }
  0x3f   :  { %980 = vmatpush3.msra.mxu0 %v413_v55 }
  0x40   :  { %981 = vmatprep.subr.mxu0 %v1018_v29 }
  0x41   :  { %982 = vmatpush3.msra.mxu0 %v412_v56 }
  0x42   :  { %991 = vmatprep.subr.mxu0 %v1018_v29 }
  0xd2   :  { %v880_v14 = vpop.f32.mrf.mxu0 }
  0xd4   :  { %v114_v15 = vpop.f32.mrf.mxu0  ;;  %v892_v20 = vpop.f32.mrf.mxu1 }
  0xd6   :  { %v881_v16 = vpop.f32.mrf.mxu0  ;;  %v205_v23 = vpop.f32.mrf.mxu1 }
  0xd7   :  { %v130_v17 = vpack.c.bf16 %v881_v16, %v880_v14 }
  0xd8   :  { %v117_v18 = vpop.f32.mrf.mxu0  ;;  %v893_v27 = vpop.f32.mrf.mxu1 }
  0xd9   :  { %v129_v19 = vpack.c.bf16 %v117_v18, %v114_v15  ;;  %132 = vrot.lane.b32.xlu1 %v130_v17, %s1017_s28  ;;  %v221_v30 = vpack.c.bf16 %v893_v27, %v892_v20 }
  0xda   :  { %v208_v35 = vpop.f32.mrf.mxu1 }
  0xdb   :  { %v220_v38 = vpack.c.bf16 %v208_v35, %v205_v23 }
  0xe2   :  { %v904_v21 = vpop.f32.mrf.mxu0 }
  0xe4   :  { %v296_v22 = vpop.f32.mrf.mxu0 }
  0xe6   :  { %v905_v24 = vpop.f32.mrf.mxu0 }
  0xe7   :  { %v312_v26 = vpack.c.bf16 %v905_v24, %v904_v21 }
  0xe8   :  { %v299_v33 = vpop.f32.mrf.mxu0 }
  0xe9   :  { %314 = vrot.lane.b32.xlu0 %v312_v26, %s1017_s28  ;;  %v311_v34 = vpack.c.bf16 %v299_v33, %v296_v22 }
  0xed   :  { %223 = vrot.lane.b32.xlu0 %v221_v30, %s1017_s28 }
 0x14b   :  { %v133_v39 = vpop.permute.xlu1 %132 }
 0x14c   :  { %v136_v42 = vsel %vm73_vm0, %v129_v19, %v133_v39  ;;  %v574_v19 = vld [vmem:[%s1252_s6] sm:$0xf] }
 0x15b   :  { %v315_v36 = vpop.permute.xlu0 %314 }
 0x15c   :  { %v318_v37 = vsel %vm73_vm0, %v311_v34, %v315_v36  ;;  %v726_v34 = vld [vmem:[%s1253_s3] sm:$0x1] }
 0x15d   :  { %906 = vmatprep.subr.bf16.mxu1 %v318_v37 }
 0x15e   :  { %907 = vmatpush3.bf16.msra.mxu1 %v318_v37 }
 0x15f   :  { %v224_v40 = vpop.permute.xlu0 %223 }
 0x160   :  { %v227_v41 = vsel %vm73_vm0, %v220_v38, %v224_v40  ;;  %v728_v38 = vld [vmem:[%s1254_s4] sm:$0x1] }
 0x161   :  { %908 = vmatprep.subr.bf16.mxu1 %v227_v41 }
 0x162   :  { %909 = vmatpush3.bf16.msra.mxu1 %v227_v41 }
 0x163   :  { %910 = vmatprep.subr.bf16.mxu1 %v136_v42 }
 0x166   :  { %911 = vmatpush3.bf16.msra.mxu1 %v136_v42 }
 0x167   :  { %916 = vmatprep.subr.mxu1 %v1018_v29 }
 0x169   :  { %913 = vmatmul.mubr.msk.bf16.vlgmr.msra.gmra.mxu1 %vm334_vm1, %v1014_v43 }
 0x16a   :  { %917 = vmatpush3.msra.mxu1 %v427_v28  ;;  %948 = vmatprep.mubr.msk.f32.mxu1 %vm1019_vm2, %v1018_v29 }
 0x16b   :  { %918 = vmatprep.subr.mxu1 %v1018_v29 }
 0x16c   :  { %919 = vmatpush3.msra.mxu1 %v426_v31 }
 0x16d   :  { %920 = vmatprep.subr.mxu1 %v1018_v29 }
 0x16e   :  { %921 = vmatpush3.msra.mxu1 %v425_v32  ;;  %v731_v32 = vlaneseq }
 0x16f   :  { %922 = vmatprep.subr.mxu1 %v1018_v29 }
 0x170   :  { %923 = vmatpush3.msra.mxu1 %v424_v44  ;;  %v732_v33 = vshrl.u32 %v731_v32, 7 }
 0x171   :  { %924 = vmatprep.subr.mxu1 %v1018_v29 }
 0x172   :  { %925 = vmatpush3.msra.mxu1 %v423_v45  ;;  %v733_v35 = vsub.s32 0, %v732_v33 }
 0x173   :  { %926 = vmatprep.subr.mxu1 %v1018_v29 }
 0x174   :  { %927 = vmatpush3.msra.mxu1 %v422_v46 }
 0x175   :  { %928 = vmatprep.subr.mxu1 %v1018_v29 }
 0x176   :  { %929 = vmatpush3.msra.mxu1 %v421_v47 }
 0x177   :  { %930 = vmatprep.subr.mxu1 %v1018_v29 }
 0x178   :  { %931 = vmatpush3.msra.mxu1 %v420_v48 }
 0x179   :  { %932 = vmatprep.subr.mxu1 %v1018_v29 }
 0x17a   :  { %933 = vmatpush3.msra.mxu1 %v419_v49 }
 0x17b   :  { %934 = vmatprep.subr.mxu1 %v1018_v29 }
 0x17c   :  { %935 = vmatpush3.msra.mxu1 %v418_v50 }
 0x17d   :  { %936 = vmatprep.subr.mxu1 %v1018_v29 }
 0x17e   :  { %937 = vmatpush3.msra.mxu1 %v417_v51 }
 0x17f   :  { %938 = vmatprep.subr.mxu1 %v1018_v29 }
 0x180   :  { %939 = vmatpush3.msra.mxu1 %v416_v52 }
 0x181   :  { %940 = vmatprep.subr.mxu1 %v1018_v29 }
 0x182   :  { %941 = vmatpush3.msra.mxu1 %v415_v53 }
 0x183   :  { %942 = vmatprep.subr.mxu1 %v1018_v29 }
 0x184   :  { %943 = vmatpush3.msra.mxu1 %v414_v54 }
 0x185   :  { %944 = vmatprep.subr.mxu1 %v1018_v29 }
 0x186   :  { %945 = vmatpush3.msra.mxu1 %v413_v55 }
 0x187   :  { %946 = vmatprep.subr.mxu1 %v1018_v29 }
 0x188   :  { %947 = vmatpush3.msra.mxu1 %v412_v56 }
 0x189   :  { %986 = vmatprep.subr.mxu1 %v1018_v29 }
 0x229   :  { %v1205_v57 = vpop.f32.mrf.mxu1 }
 0x22a   :  { %v401_v0 = vmul.f32 %v1205_v57, %v1205_v57 }
 0x22b   :  { %v1207_v58 = vpop.f32.mrf.mxu1 }
 0x22c   :  { %v399_v61 = vmul.f32 %v1207_v58, %v1207_v58 }
 0x22d   :  { %v1209_v59 = vpop.f32.mrf.mxu1 }
 0x22e   :  { %v402_v3 = vmul.f32 %v1209_v59, %v1209_v59 }
 0x22f   :  { %v378_v60 = vpop.f32.mrf.mxu1 }
 0x230   :  { %v390_v62 = vadd.f32 %v378_v60, %v1207_v58  ;;  %v400_v63 = vmul.f32 %v378_v60, %v378_v60 }
 0x232   :  { %v391_v1 = vadd.f32 %v1205_v57, %v390_v62  ;;  %v403_v2 = vadd.f32 %v400_v63, %v399_v61 }
 0x234   :  { %v392_v4 = vadd.f32 %v1209_v59, %v391_v1  ;;  %v404_v5 = vadd.f32 %v403_v2, %v401_v0 }
 0x236   :  { %v393_v6 = vrot.slane %v392_v4, 4  ;;  %v405_v7 = vadd.f32 %v404_v5, %v402_v3 }
 0x238   :  { %v394_v8 = vadd.f32 %v393_v6, %v392_v4  ;;  %v406_v9 = vrot.slane %v405_v7, 4 }
 0x23a   :  { %v395_v10 = vrot.slane %v394_v8, 2  ;;  %v407_v11 = vadd.f32 %v406_v9, %v405_v7 }
 0x23c   :  { %v396_v12 = vadd.f32 %v395_v10, %v394_v8  ;;  %v408_v13 = vrot.slane %v407_v11, 2 }
 0x23e   :  { %v397_v14 = vrot.slane %v396_v12, 1  ;;  %v409_v15 = vadd.f32 %v408_v13, %v407_v11 }
 0x240   :  { %v398_v16 = vadd.f32 %v397_v14, %v396_v12  ;;  %v410_v17 = vrot.slane %v409_v15, 1 }
 0x242   :  { %949 = vmatmul.mubr.f32.vlgmr.msra.gmra.mxu1 %v398_v16  ;;  %v411_v18 = vadd.f32 %v410_v17, %v409_v15 }
 0x243   :  { %988 = vmatprep.mubr.msk.f32.mxu1 %vm1019_vm2, %v1018_v29  ;;  %987 = vmatpush3.msk.msra.mxu1 %vm579_vm3, %v574_v19 }
 0x244   :  { %984 = vmatmul.mubr.f32.vlgmr.msra.gmra.mxu0 %v411_v18 }
 0x245   :  { %993 = vmatprep.mubr.msk.f32.mxu0 %vm1019_vm2, %v1018_v29  ;;  %992 = vmatpush3.msk.msra.mxu0 %vm579_vm3, %v574_v19 }
 0x302   :  { %v494_v20 = vpop.f32.mrf.mxu1 }
 0x303   :  { %v498_v21 = vmul.f32 0.0009765625, %v494_v20 }
 0x304   :  { %v950_v22 = vpop.f32.mrf.mxu1  ;;  %v565_v23 = vpop.f32.mrf.mxu0 }
 0x305   :  { %v570_v24 = vmul.f32 %v498_v21, %v498_v21  ;;  %v569_v25 = vmul.f32 0.0009765625, %v565_v23  ;;  %989 = vmatmul.mubr.msk.f32.vlgmr.msra.gmra.mxu1 %vm575_vm4, %v498_v21 }
 0x306   :  { %v985_v26 = vpop.f32.mrf.mxu0 }
 0x307   :  { %v571_v27 = vsub.f32 %v569_v25, %v570_v24 }
 0x309   :  { %v572_v28 = vadd.f32 1e-05, %v571_v27 }
 0x30b   :  { %1015 = vrsqrt.f32 %v572_v28 }
 0x318   :  { %v1016_v29 = vpop.eup %1015 }
 0x319   :  { %994 = vmatmul.mubr.msk.f32.vlgmr.msra.gmra.mxu0 %vm575_vm4, %v1016_v29 }
 0x3c5   :  { %v649_v30 = vpop.f32.mrf.mxu1 }
 0x3c7   :  { %v990_v31 = vpop.f32.mrf.mxu1 }
 0x3d9   :  { %v722_v36 = vpop.f32.mrf.mxu0 }
 0x3da   :  { %v727_v37 = vmul.f32 %v726_v34, %v722_v36 }
 0x3db   :  { %v995_v39 = vpop.f32.mrf.mxu0 }
 0x3dc   :  { %v729_v40 = vmul.f32 %v727_v37, %v649_v30  ;;  %v734_v41 = vrot.slane %v727_v37, %v733_v35 }
 0x3de   :  { %v730_v42 = vsub.f32 %v728_v38, %v729_v40  ;;  %v735_v43 = vmul.f32 %v734_v41, %v1207_v58  ;;  %v736_v44 = vmul.f32 %v734_v41, %v378_v60  ;;  %v737_v45 = vmul.f32 %v1205_v57, %v734_v41 }
 0x3df   :  { %v738_v46 = vmul.f32 %v1209_v59, %v734_v41 }
 0x3e0   :  { %v743_v47 = vrot.slane %v730_v42, %v733_v35 }
 0x3e2   :  { %v745_v48 = vadd.f32 %v743_v47, %v735_v43  ;;  %v746_v49 = vadd.f32 %v743_v47, %v736_v44  ;;  %v747_v50 = vadd.f32 %v743_v47, %v737_v45  ;;  %v748_v51 = vadd.f32 %v743_v47, %v738_v46 }
 0x3e4   :  { %v749_v52 = vmul.f32 0.01, %v745_v48  ;;  %v750_v53 = vmul.f32 0.01, %v746_v49  ;;  %v751_v54 = vmul.f32 0.01, %v747_v50 }
 0x3e5   :  { %v752_v55 = vmul.f32 0.01, %v748_v51 }
 0x3e6   :  { %v753_v56 = vmax.f32 %v745_v48, %v749_v52  ;;  %v754_v61 = vmax.f32 %v746_v49, %v750_v53  ;;  %v755_v62 = vmax.f32 %v747_v50, %v751_v54 }
 0x3e7   :  { %v756_v63 = vmax.f32 %v748_v51, %v752_v55 }
 0x3e8   :  { %757 = vst [vmem:[%s1255_s7] sm:$0xff] %v753_v56  ;;  %758 = vst [vmem:[%s1255_s7 + $0x8] sm:$0xff] %v754_v61 }
 0x3e9   :  { %759 = vst [vmem:[%s1255_s7 + $0x10] sm:$0xff] %v755_v62  ;;  %760 = vst [vmem:[%s1255_s7 + $0x18] sm:$0xff] %v756_v63 }

</bundles_post_ra>
